<compile_context>
chip_gen: v6e
topology: v6e:2x2x1
jax: 0.10.0
libtpu: 0.0.40
codegen_flags: <defaults>
</compile_context>

<pallas_src>
import jax
import jax.numpy as jnp
from jax.experimental import pallas as pl
from jax.experimental.pallas import tpu as pltpu


# ---------------------------------------------------------------------------
# Kernels
# ---------------------------------------------------------------------------
def _matmul_single_kernel(a_ref, b_ref, o_ref):
    # Whole problem in one block: one MXU pass, no grid machinery.
    o_ref[...] = jnp.dot(a_ref[...], b_ref[...], preferred_element_type=jnp.float32)


def _matmul_tiled_kernel(a_ref, b_ref, o_ref):
    # Grid: (Mp//tm, Np//tn, Kp//tk). Output block index is constant along K,
    # so o_ref stays resident in VMEM across the K loop -> accumulate in place
    # (no separate VMEM scratch, no epilogue copy).
    @pl.when(pl.program_id(2) == 0)
    def _():
        o_ref[...] = jnp.zeros_like(o_ref)

    o_ref[...] += jnp.dot(a_ref[...], b_ref[...], preferred_element_type=jnp.float32)


# ---------------------------------------------------------------------------
# Helpers
# ---------------------------------------------------------------------------
def _cdiv(a: int, b: int) -> int:
    return (a + b - 1) // b


def _round_up(x: int, m: int) -> int:
    return _cdiv(x, m) * m


def _vmem_budget_bytes() -> int:
    """Generation-aware VMEM limit (v5e/v6e: 128 MiB, v7x: 64 MiB per TC)."""
    try:
        cap = int(pltpu.get_tpu_info().vmem_capacity_bytes)
    except Exception:
        cap = 64 * 1024 * 1024  # conservative default (v7x-sized)
    # Leave ~25% headroom for Mosaic scratch / misc allocations.
    return max(32 * 1024 * 1024, (cap * 3) // 4)


def _pick_tile(dim: int, target: int, align: int) -> int:
    """Tile size that divides `dim` near-evenly, rounded up to `align`."""
    n_tiles = max(1, _cdiv(dim, max(target, align)))
    return _round_up(_cdiv(dim, n_tiles), align)


def _tile_bytes(tm: int, tn: int, tk: int) -> int:
    # f32: double-buffered A and B tiles + (conservatively double-buffered)
    # resident C tile.
    return 4 * (2 * tm * tk + 2 * tk * tn + 2 * tm * tn)


# Problems whose A + B + C footprint is below this go through the single-block
# (no-grid, no-pad) fast path.
_SMALL_BYTES_LIMIT = 4 * 1024 * 1024


# ---------------------------------------------------------------------------
# Wrapper
# ---------------------------------------------------------------------------
def matmul(a: jax.Array, b: jax.Array, *, tm: int = 512, tn: int = 1024,
           tk: int = 512, small_bytes_limit: int = _SMALL_BYTES_LIMIT):
    """C = A @ B for float32 A:[M,K], B:[K,N] with arbitrary (irregular) shapes."""
    M, K = a.shape
    K2, N = b.shape
    assert K == K2, f"inner dims mismatch: {K} vs {K2}"

    a = a.astype(jnp.float32)
    b = b.astype(jnp.float32)

    flops = 2 * M * N * K

    # ---- Small path: one full-array block each, no padding, no grid. -------
    if 4 * (M * K + K * N + M * N) <= small_bytes_limit:
        return pl.pallas_call(
            _matmul_single_kernel,
            out_shape=jax.ShapeDtypeStruct((M, N), jnp.float32),
            cost_estimate=pl.CostEstimate(
                flops=flops,
                bytes_accessed=4 * (M * K + K * N + M * N),
                transcendentals=0,
            ),
        )(a, b)

    # ---- Tiled path: large shapes. -----------------------------------------
    vmem_limit = _vmem_budget_bytes()
    tile_budget = vmem_limit - 8 * 1024 * 1024  # margin for pipeline bookkeeping

    # Near-even, (8,128)-aligned tiles: pad waste capped at one alignment
    # row/col per dim regardless of the user-supplied target sizes.
    tm = _pick_tile(M, max(tm, 8), 8)
    tk = _pick_tile(K, max(tk, 128), 128)
    tn = _pick_tile(N, max(tn, 128), 128)

    # Shrink the largest tile dim until the working set fits the VMEM budget.
    while _tile_bytes(tm, tn, tk) > tile_budget:
        if tn >= tm and tn >= tk and tn > 128:
            tn = _round_up(_cdiv(tn, 2), 128)
        elif tk >= tm and tk > 128:
            tk = _round_up(_cdiv(tk, 2), 128)
        elif tm > 8:
            tm = _round_up(_cdiv(tm, 2), 8)
        else:
            break

    # Megacore: the parallel (i, j) grid axes must expose >= 2 output tiles so
    # both TensorCores (v7x) get work.
    if _cdiv(M, tm) * _cdiv(N, tn) < 2:
        if M > 8:
            tm = _round_up(_cdiv(M, 2), 8)
        elif N > 128:
            tn = _round_up(_cdiv(N, 2), 128)

    Mp = _round_up(M, tm)
    Kp = _round_up(K, tk)
    Np = _round_up(N, tn)

    # Zero padding does not change the product.
    a_p = a if (Mp == M and Kp == K) else jnp.pad(a, ((0, Mp - M), (0, Kp - K)))
    b_p = b if (Kp == K and Np == N) else jnp.pad(b, ((0, Kp - K), (0, Np - N)))

    c_p = pl.pallas_call(
        _matmul_tiled_kernel,
        out_shape=jax.ShapeDtypeStruct((Mp, Np), jnp.float32),
        grid_spec=pltpu.PrefetchScalarGridSpec(
            num_scalar_prefetch=0,
            grid=(Mp // tm, Np // tn, Kp // tk),
            in_specs=[
                pl.BlockSpec((tm, tk), lambda i, j, k: (i, k)),
                pl.BlockSpec((tk, tn), lambda i, j, k: (k, j)),
            ],
            out_specs=pl.BlockSpec((tm, tn), lambda i, j, k: (i, j)),
        ),
        compiler_params=pltpu.CompilerParams(
            dimension_semantics=("parallel", "parallel", "arbitrary"),
            vmem_limit_bytes=vmem_limit,
        ),
        cost_estimate=pl.CostEstimate(
            flops=2 * Mp * Np * Kp,
            bytes_accessed=4 * (Mp * Kp + Kp * Np + Mp * Np),
            transcendentals=0,
        ),
    )(a_p, b_p)

    if Mp == M and Np == N:
        return c_p
    return c_p[:M, :N]


# ---------------------------------------------------------------------------
# Self-test
# ---------------------------------------------------------------------------
if __name__ == "__main__":
    key = jax.random.PRNGKey(0)
    ka, kb, kc, kd = jax.random.split(key, 4)

    # 1) Irregular small shapes (the module's actual use case) -> single-block
    #    fast path, no pad/slice.
    M, K, N = 100, 75, 50
    A = jax.random.normal(ka, (M, K), dtype=jnp.float32)
    B = jax.random.normal(kb, (K, N), dtype=jnp.float32)

    C = jax.block_until_ready(matmul(A, B))
    C_ref = A @ B
    assert C.shape == (M, N), C.shape
    assert jnp.allclose(C, C_ref, atol=1e-3, rtol=1e-3), float(
        jnp.max(jnp.abs(C - C_ref))
    )

    # 2) Exercise the tiled (large-shape) path with small tile targets so it
    #    stays cheap, forcing it past the small-path threshold.  Adaptive
    #    tiling + megacore split + K-accumulation are all exercised here.
    M2, K2, N2 = 300, 257, 130
    A2 = jax.random.normal(kc, (M2, K2), dtype=jnp.float32)
    B2 = jax.random.normal(kd, (K2, N2), dtype=jnp.float32)

    C2 = jax.block_until_ready(
        matmul(A2, B2, tm=128, tn=128, tk=128, small_bytes_limit=0)
    )
    C2_ref = A2 @ B2
    assert C2.shape == (M2, N2), C2.shape
    assert jnp.allclose(C2, C2_ref, atol=1e-3, rtol=1e-3), float(
        jnp.max(jnp.abs(C2 - C2_ref))
    )

    print("KERNEL_OK")
</pallas_src>

<mosaic_0001>
module attributes {stable_mosaic.version = 11 : i64} {
  func.func @_matmul_single_kernel(%arg0: memref<100x75xf32, #tpu.memory_space<vmem>>, %arg1: memref<75x50xf32, #tpu.memory_space<vmem>>, %arg2: memref<100x50xf32, #tpu.memory_space<vmem>>) attributes {dimension_semantics = [], scalar_prefetch = 0 : i64, scratch_operands = 0 : i64, tpu.core_type = #tpu.core_type<tc>} {
    %c0 = arith.constant 0 : index
    %c0_0 = arith.constant 0 : index
    %0 = vector.load %arg0[%c0, %c0_0] : memref<100x75xf32, #tpu.memory_space<vmem>>, vector<100x75xf32>
    %c0_1 = arith.constant 0 : index
    %c0_2 = arith.constant 0 : index
    %1 = vector.load %arg1[%c0_1, %c0_2] : memref<75x50xf32, #tpu.memory_space<vmem>>, vector<75x50xf32>
    %cst = arith.constant dense<0.000000e+00> : vector<100x50xf32>
    %2 = tpu.matmul %0, %1, %cst {dimension_numbers = #tpu.dot_dimension_numbers<[1], [0], [0], [1], [0, 0, 1, 1], [], []>} : vector<100x75xf32>, vector<75x50xf32>, vector<100x50xf32> -> vector<100x50xf32>
    %c0_3 = arith.constant 0 : index
    %c0_4 = arith.constant 0 : index
    %3 = vector.load %arg2[%c0_3, %c0_4] : memref<100x50xf32, #tpu.memory_space<vmem>>, vector<100x50xf32>
    tpu.vector_store %arg2[%c0_3, %c0_4], %2 {strides = array<i32>} : memref<100x50xf32, #tpu.memory_space<vmem>>, vector<100x50xf32>,
    return
  }
}

</mosaic_0001>

<bundles_post_ra>
// kernel: tpu_custom_call.1
= control target key start
LH: loop header
LB: loop body
LE: loop exit
PB: predicated region body
PF: predicated region fallthrough
CT: control target
= control target key end

     0   :  { %vm74_vm0 = vcmask 1042432   ;;  %v345_v0 = vmov 0.0   ;;  %vm34_vm1 = vcmask 613376   ;;  %vm346_vm2 = vmmov 0   ;;  %s541_s1 = inlined_call_operand.vmem [shape: f32[75,50], index: 1, kind: input, shape index: {}]   ;;  %s542_s0 = inlined_call_operand.vmem [shape: f32[100,75], index: 0, kind: input, shape index: {}]   ;;  %s543_s2 = inlined_call_operand.vmem [shape: f32[100,50], index: 2, kind: output, shape index: {}]  }
   0x1   :  { %264 = vmatprep.subr.mxu0 %v345_v0  ;;  %v33_v1 = vld [vmem:[%s541_s1 + $0x48] sm:$0x7]  ;;  %323 = vmatprep.subr.mxu1 %v345_v0  ;;  %v32_v2 = vld [vmem:[%s541_s1 + $0x40] sm:$0xff]  ;;  %v31_v3 = vld [vmem:[%s541_s1 + $0x38] sm:$0xff]  ;;  %vm208_vm3 = vcmask 408576   ;;  %vm221_vm4 = vcmask 404480  }
   0x2   :  { %265 = vmatpush3.msk.msra.mxu0 %vm74_vm0, %v33_v1  ;;  %333 = vmatpush3.msk.msra.mxu1 %vm74_vm0, %v33_v1  ;;  %v30_v4 = vld [vmem:[%s541_s1 + $0x30] sm:$0xff]  ;;  %v29_v5 = vld [vmem:[%s541_s1 + $0x28] sm:$0xff]  ;;  %v28_v6 = vld [vmem:[%s541_s1 + $0x20] sm:$0xff] }
   0x3   :  { %266 = vmatprep.subr.mxu0 %v345_v0  ;;  %324 = vmatprep.subr.mxu1 %v345_v0  ;;  %v27_v7 = vld [vmem:[%s541_s1 + $0x18] sm:$0xff]  ;;  %v26_v8 = vld [vmem:[%s541_s1 + $0x10] sm:$0xff]  ;;  %v25_v9 = vld [vmem:[%s541_s1 + $0x8] sm:$0xff] }
   0x4   :  { %267 = vmatpush3.msra.mxu0 %v32_v2  ;;  %334 = vmatpush3.msra.mxu1 %v32_v2  ;;  %v24_v10 = vld [vmem:[%s541_s1] sm:$0xff]  ;;  %v18_v12 = vld [vmem:[%s542_s0 + $0x38] sm:$0xff]  ;;  %v12_v13 = vld [vmem:[%s542_s0 + $0x8] sm:$0xff] }
   0x5   :  { %268 = vmatprep.subr.mxu0 %v345_v0  ;;  %325 = vmatprep.subr.mxu1 %v345_v0  ;;  %v11_v11 = vld [vmem:[%s542_s0] sm:$0xff]  ;;  %v13_v15 = vld [vmem:[%s542_s0 + $0x10] sm:$0xff]  ;;  %v20_v16 = vld [vmem:[%s542_s0 + $0x48] sm:$0xff] }
   0x6   :  { %269 = vmatpush3.msra.mxu0 %v31_v3  ;;  %335 = vmatpush3.msra.mxu1 %v31_v3  ;;  %v19_v14 = vld [vmem:[%s542_s0 + $0x40] sm:$0xff]  ;;  %v14_v17 = vld [vmem:[%s542_s0 + $0x18] sm:$0xff]  ;;  %v21_v18 = vld [vmem:[%s542_s0 + $0x50] sm:$0xff] }
   0x7   :  { %270 = vmatprep.subr.mxu0 %v345_v0  ;;  %326 = vmatprep.subr.mxu1 %v345_v0  ;;  %v15_v19 = vld [vmem:[%s542_s0 + $0x20] sm:$0xff]  ;;  %v22_v20 = vld [vmem:[%s542_s0 + $0x58] sm:$0xff]  ;;  %v16_v21 = vld [vmem:[%s542_s0 + $0x28] sm:$0xff] }
   0x8   :  { %271 = vmatpush3.msra.mxu0 %v30_v4  ;;  %336 = vmatpush3.msra.mxu1 %v30_v4  ;;  %v23_v22 = vld [vmem:[%s542_s0 + $0x60] sm:$0xf]  ;;  %v17_v23 = vld [vmem:[%s542_s0 + $0x30] sm:$0xff] }
   0x9   :  { %272 = vmatprep.subr.mxu0 %v345_v0  ;;  %327 = vmatprep.subr.mxu1 %v345_v0 }
   0xa   :  { %273 = vmatpush3.msra.mxu0 %v29_v5  ;;  %337 = vmatpush3.msra.mxu1 %v29_v5 }
   0xb   :  { %274 = vmatprep.subr.mxu0 %v345_v0  ;;  %328 = vmatprep.subr.mxu1 %v345_v0 }
   0xc   :  { %275 = vmatpush3.msra.mxu0 %v28_v6  ;;  %338 = vmatpush3.msra.mxu1 %v28_v6 }
   0xd   :  { %276 = vmatprep.subr.mxu0 %v345_v0  ;;  %329 = vmatprep.subr.mxu1 %v345_v0 }
   0xe   :  { %277 = vmatpush3.msra.mxu0 %v27_v7  ;;  %339 = vmatpush3.msra.mxu1 %v27_v7 }
   0xf   :  { %278 = vmatprep.subr.mxu0 %v345_v0  ;;  %330 = vmatprep.subr.mxu1 %v345_v0 }
  0x10   :  { %279 = vmatpush3.msra.mxu0 %v26_v8  ;;  %340 = vmatpush3.msra.mxu1 %v26_v8 }
  0x11   :  { %280 = vmatprep.subr.mxu0 %v345_v0  ;;  %331 = vmatprep.subr.mxu1 %v345_v0 }
  0x12   :  { %281 = vmatpush3.msra.mxu0 %v25_v9  ;;  %341 = vmatpush3.msra.mxu1 %v25_v9 }
  0x13   :  { %282 = vmatprep.subr.mxu0 %v345_v0  ;;  %284 = vmatprep.mubr.msk.f32.mxu0 %vm346_vm2, %v345_v0 }
  0x14   :  { %283 = vmatpush3.msra.mxu0 %v24_v10  ;;  %332 = vmatprep.subr.mxu1 %v345_v0 }
  0x15   :  { %285 = vmatmul.mubr.msk.f32.vlgmr.msra.gmra.mxu0 %vm34_vm1, %v11_v11  ;;  %342 = vmatpush3.msra.mxu1 %v24_v10 }
  0x16   :  { %305 = vmatprep.mubr.msk.f32.mxu1 %vm346_vm2, %v345_v0  ;;  %287 = vmatprep.mubr.msk.f32.mxu0 %vm346_vm2, %v345_v0 }
  0x17   :  { %306 = vmatmul.mubr.msk.f32.vlgmr.msra.gmra.mxu1 %vm34_vm1, %v18_v12 }
  0x18   :  { %308 = vmatprep.mubr.msk.f32.mxu1 %vm346_vm2, %v345_v0 }
  0x19   :  { %288 = vmatmul.mubr.msk.f32.gmra.mxu0 %vm34_vm1, %v12_v13 }
  0x1a   :  { %290 = vmatprep.mubr.msk.f32.mxu0 %vm346_vm2, %v345_v0 }
  0x1b   :  { %309 = vmatmul.mubr.msk.f32.gmra.mxu1 %vm34_vm1, %v19_v14 }
  0x1c   :  { %311 = vmatprep.mubr.msk.f32.mxu1 %vm346_vm2, %v345_v0 }
  0x1d   :  { %291 = vmatmul.mubr.msk.f32.gmra.mxu0 %vm34_vm1, %v13_v15 }
  0x1e   :  { %293 = vmatprep.mubr.msk.f32.mxu0 %vm346_vm2, %v345_v0 }
  0x1f   :  { %312 = vmatmul.mubr.msk.f32.gmra.mxu1 %vm34_vm1, %v20_v16 }
  0x20   :  { %314 = vmatprep.mubr.msk.f32.mxu1 %vm346_vm2, %v345_v0 }
  0x21   :  { %294 = vmatmul.mubr.msk.f32.gmra.mxu0 %vm34_vm1, %v14_v17 }
  0x22   :  { %296 = vmatprep.mubr.msk.f32.mxu0 %vm346_vm2, %v345_v0 }
  0x23   :  { %315 = vmatmul.mubr.msk.f32.gmra.mxu1 %vm34_vm1, %v21_v18 }
  0x24   :  { %317 = vmatprep.mubr.msk.f32.mxu1 %vm346_vm2, %v345_v0 }
  0x25   :  { %297 = vmatmul.mubr.msk.f32.gmra.mxu0 %vm34_vm1, %v15_v19 }
  0x26   :  { %299 = vmatprep.mubr.msk.f32.mxu0 %vm346_vm2, %v345_v0 }
  0x27   :  { %318 = vmatmul.mubr.msk.f32.gmra.mxu1 %vm34_vm1, %v22_v20 }
  0x28   :  { %320 = vmatprep.mubr.msk.f32.mxu1 %vm346_vm2, %v345_v0 }
  0x29   :  { %300 = vmatmul.mubr.msk.f32.gmra.mxu0 %vm34_vm1, %v16_v21 }
  0x2a   :  { %302 = vmatprep.mubr.msk.f32.mxu0 %vm346_vm2, %v345_v0 }
  0x2b   :  { %321 = vmatmul.mubr.msk.f32.gmra.mxu1 %vm34_vm1, %v23_v22 }
  0x2d   :  { %303 = vmatmul.mubr.msk.f32.gmra.mxu0 %vm34_vm1, %v17_v23 }
  0xd5   :  { %v144_v24 = vpop.f32.mrf.mxu0 }
  0xd6   :  { %209 = vst.msk [vmem:[%s543_s2] sm:$0xff] %vm208_vm3, %v144_v24 }
  0xd7   :  { %v286_v25 = vpop.f32.mrf.mxu0  ;;  %v179_v26 = vpop.f32.mrf.mxu1 }
  0xd8   :  { %216 = vst.msk [vmem:[%s543_s2 + $0x38] sm:$0xff] %vm208_vm3, %v179_v26 }
  0xd9   :  { %v149_v27 = vpop.f32.mrf.mxu0  ;;  %v307_v28 = vpop.f32.mrf.mxu1 }
  0xda   :  { %210 = vst.msk [vmem:[%s543_s2 + $0x8] sm:$0xff] %vm208_vm3, %v149_v27 }
  0xdb   :  { %v289_v29 = vpop.f32.mrf.mxu0  ;;  %v184_v30 = vpop.f32.mrf.mxu1 }
  0xdc   :  { %217 = vst.msk [vmem:[%s543_s2 + $0x40] sm:$0xff] %vm208_vm3, %v184_v30 }
  0xdd   :  { %v154_v31 = vpop.f32.mrf.mxu0  ;;  %v310_v32 = vpop.f32.mrf.mxu1 }
  0xde   :  { %211 = vst.msk [vmem:[%s543_s2 + $0x10] sm:$0xff] %vm208_vm3, %v154_v31 }
  0xdf   :  { %v292_v33 = vpop.f32.mrf.mxu0  ;;  %v189_v34 = vpop.f32.mrf.mxu1 }
  0xe0   :  { %218 = vst.msk [vmem:[%s543_s2 + $0x48] sm:$0xff] %vm208_vm3, %v189_v34 }
  0xe1   :  { %v159_v35 = vpop.f32.mrf.mxu0  ;;  %v313_v36 = vpop.f32.mrf.mxu1 }
  0xe2   :  { %212 = vst.msk [vmem:[%s543_s2 + $0x18] sm:$0xff] %vm208_vm3, %v159_v35 }
  0xe3   :  { %v295_v37 = vpop.f32.mrf.mxu0  ;;  %v194_v38 = vpop.f32.mrf.mxu1 }
  0xe4   :  { %219 = vst.msk [vmem:[%s543_s2 + $0x50] sm:$0xff] %vm208_vm3, %v194_v38 }
  0xe5   :  { %v164_v39 = vpop.f32.mrf.mxu0  ;;  %v316_v40 = vpop.f32.mrf.mxu1 }
  0xe6   :  { %213 = vst.msk [vmem:[%s543_s2 + $0x20] sm:$0xff] %vm208_vm3, %v164_v39 }
  0xe7   :  { %v298_v41 = vpop.f32.mrf.mxu0  ;;  %v199_v42 = vpop.f32.mrf.mxu1 }
  0xe8   :  { %220 = vst.msk [vmem:[%s543_s2 + $0x58] sm:$0xff] %vm208_vm3, %v199_v42 }
  0xe9   :  { %v169_v43 = vpop.f32.mrf.mxu0  ;;  %v319_v44 = vpop.f32.mrf.mxu1 }
  0xea   :  { %214 = vst.msk [vmem:[%s543_s2 + $0x28] sm:$0xff] %vm208_vm3, %v169_v43 }
  0xeb   :  { %v301_v45 = vpop.f32.mrf.mxu0  ;;  %v204_v46 = vpop.f32.mrf.mxu1 }
  0xec   :  { %222 = vst.msk [vmem:[%s543_s2 + $0x60] sm:$0xf] %vm221_vm4, %v204_v46 }
  0xed   :  { %v174_v47 = vpop.f32.mrf.mxu0  ;;  %v322_v48 = vpop.f32.mrf.mxu1 }
  0xee   :  { %215 = vst.msk [vmem:[%s543_s2 + $0x30] sm:$0xff] %vm208_vm3, %v174_v47 }
  0xef   :  { %v304_v49 = vpop.f32.mrf.mxu0 }

</bundles_post_ra>
